<compile_context>
chip_gen: v7x
topology: tpu7x:2x2x1
jax: 0.10.0
libtpu: 0.0.40
codegen_flags: <defaults>
</compile_context>

<pallas_src>
import jax
import jax.numpy as jnp
from jax.experimental import pallas as pl
from jax.experimental.pallas import tpu as pltpu


def mil_kernel(x_ref, proj_ref, w_ref, b_ref, out_ref, feat_scr):
    # x_ref:    (Cin, TB, S)       channel-major pooled input (S=49, unpadded)
    # proj_ref: (Cf, Cin)   f32    stand-in backbone 1x1-conv weight
    # w_ref:    (S_pad, V)  bf16   classifier weight, pre-transposed & padded
    # b_ref:    (1, V)      f32    classifier bias (padded cols = -1e30)
    # out_ref:  (TB, V)     f32
    # feat_scr: (TB*Cf, S_pad) f32 VMEM scratch: lane-padded matmul LHS
    Cin, TB, S = x_ref.shape
    Cf = proj_ref.shape[0]
    V = w_ref.shape[1]

    proj = proj_ref[...]                                     # (Cf, Cin)

    # --- stand-in backbone 1x1 conv on the VPU: Cin (=3) unrolled broadcast
    # FMAs over dense channel-major (TB, S) planes -----------------------------
    feat = proj[None, :, 0:1] * x_ref[0][:, None, :]         # (TB, Cf, S)
    for c in range(1, Cin):                                  # Cin is static
        feat = feat + proj[None, :, c:c + 1] * x_ref[c][:, None, :]
    feat = jnp.maximum(feat, 0.0)                            # ReLU

    # --- lane-pad K 49 -> 128 in VMEM (pad lanes stay 0: inert in the dot) ----
    feat_scr[...] = jnp.zeros_like(feat_scr)
    feat_scr[:, 0:S] = feat.reshape(TB * Cf, S)              # == x0.view(B*C,-1)

    # --- classifier Linear(49, vocab): one (TB*Cf,128)@(128,V) bf16 MXU matmul
    # with f32 accumulation ----------------------------------------------------
    scores = jnp.dot(feat_scr[...].astype(jnp.bfloat16), w_ref[...],
                     preferred_element_type=jnp.float32)     # (TB*Cf, V) f32
    scores = scores + b_ref[...]                             # broadcast (1, V)

    # --- log_softmax over the vocab dim (all f32) ------------------------------
    m = jnp.max(scores, axis=-1, keepdims=True)
    shifted = scores - m
    lse = jnp.log(jnp.sum(jnp.exp(shifted), axis=-1, keepdims=True))
    logp = shifted - lse                                     # (TB*Cf, V)

    # --- torch.max(x, 1): max over the channel (MIL instance) axis -------------
    out_ref[...] = jnp.max(logp.reshape(TB, Cf, V), axis=1)  # (TB, V)


def resnet_mil_forward(x, proj_w, clf_w, clf_b, *, tb=8):
    """x: (B, Cin, H, W) NCHW float32. Returns max-over-channel log-probs (B, vocab)."""
    B, Cin, H, W = x.shape
    Cf = proj_w.shape[0]
    V = clf_w.shape[0]
    assert H % 7 == 0 and W % 7 == 0, "spatial dims must pool cleanly to 7x7"

    S = 49
    S_PAD = 128
    V_pad = ((V + 127) // 128) * 128
    B_pad = ((B + tb - 1) // tb) * tb

    # Glue (plain JAX, fused under jit): adaptive avg-pool to 7x7, flatten,
    # transpose to channel-major (Cin, B, 49).  No spatial lane padding in HBM.
    x_p = x.reshape(B, Cin, 7, H // 7, 7, W // 7).mean(axis=(3, 5))
    x_p = x_p.reshape(B, Cin, S).astype(jnp.float32)
    x_cm = jnp.transpose(x_p, (1, 0, 2))                     # (Cin, B, 49)
    if B_pad != B:
        x_cm = jnp.pad(x_cm, ((0, 0), (0, B_pad - B), (0, 0)))

    # Classifier weight: transposed, K padded 49->128, vocab padded to x128,
    # stored in bf16 (MXU operand).  Padded rows/cols are 0.
    w_t = jnp.pad(clf_w.T.astype(jnp.float32),
                  ((0, S_PAD - S), (0, V_pad - V))).astype(jnp.bfloat16)
    # Bias stays f32; padded vocab columns get a very negative bias so they can
    # never win the channel max and add ~0 to the logsumexp (sliced off below).
    b2 = jnp.pad(clf_b.astype(jnp.float32).reshape(1, V),
                 ((0, 0), (0, V_pad - V)), constant_values=-1e30)

    out = pl.pallas_call(
        mil_kernel,
        out_shape=jax.ShapeDtypeStruct((B_pad, V_pad), jnp.float32),
        grid_spec=pltpu.PrefetchScalarGridSpec(
            num_scalar_prefetch=0,
            grid=(B_pad // tb,),
            in_specs=[
                pl.BlockSpec((Cin, tb, S), lambda b: (0, b, 0)),   # channel-major x
                pl.BlockSpec((Cf, Cin), lambda b: (0, 0)),          # proj (f32)
                pl.BlockSpec((S_PAD, V_pad), lambda b: (0, 0)),     # weight (bf16)
                pl.BlockSpec((1, V_pad), lambda b: (0, 0)),         # bias (f32)
            ],
            out_specs=pl.BlockSpec((tb, V_pad), lambda b: (b, 0)),
            scratch_shapes=[pltpu.VMEM((tb * Cf, S_PAD), jnp.float32)],
        ),
        compiler_params=pltpu.CompilerParams(
            dimension_semantics=("parallel",)),
    )(x_cm, proj_w.astype(jnp.float32), w_t, b2)

    return out[:B, :V]


def reference_forward(x, proj_w, clf_w, clf_b):
    """Pure-JAX f32 reference mirroring the PyTorch forward (no padding)."""
    B, Cin, H, W = x.shape
    x_p = x.reshape(B, Cin, 7, H // 7, 7, W // 7).mean(axis=(3, 5))
    x_p = x_p.reshape(B, Cin, 49)
    # Stand-in backbone (same elementwise formulation as the kernel).
    feat = proj_w[None, :, 0:1] * x_p[:, 0:1, :]
    for c in range(1, Cin):
        feat = feat + proj_w[None, :, c:c + 1] * x_p[:, c:c + 1, :]
    feat = jnp.maximum(feat, 0.0)                       # (B, Cf, 49)
    flat = feat.reshape(-1, 49)                         # x0.view(B*C, -1)
    scores = flat @ clf_w.T + clf_b                     # Linear(49, vocab)
    m = jnp.max(scores, axis=-1, keepdims=True)
    logp = (scores - m) - jnp.log(
        jnp.sum(jnp.exp(scores - m), axis=-1, keepdims=True))  # F.log_softmax
    logp = logp.reshape(B, proj_w.shape[0], -1)         # view(B, C, vocab)
    return jnp.max(logp, axis=1)                        # torch.max(x, 1) values


if __name__ == "__main__":
    B, Cin, H, W = 16, 3, 14, 14     # pools to 7x7 -> 49 features per channel
    Cf = 16                          # stand-in backbone channels (TB*Cf = 128)
    vocab_size = 128                 # opt.vocab_size

    key = jax.random.PRNGKey(0)
    k_x, k_proj, k_clf = jax.random.split(key, 3)

    x = jax.random.normal(k_x, (B, Cin, H, W), dtype=jnp.float32)
    proj_w = 0.1 * jax.random.normal(k_proj, (Cf, Cin), dtype=jnp.float32)
    # init_added_weights: classifier weight ~ U(-1, 1), bias = 0
    clf_w = jax.random.uniform(k_clf, (vocab_size, 49), dtype=jnp.float32,
                               minval=-1.0, maxval=1.0)
    clf_b = jnp.zeros((vocab_size,), dtype=jnp.float32)

    fwd = jax.jit(resnet_mil_forward)
    probs = fwd(x, proj_w, clf_w, clf_b)
    probs = jax.block_until_ready(probs)

    ref = reference_forward(x, proj_w, clf_w, clf_b)
    assert probs.shape == (B, vocab_size)
    # bf16 MXU operands (f32 accumulation): loosened tolerance vs f32 reference.
    assert jnp.allclose(probs, ref, atol=2e-2, rtol=2e-2), "mismatch vs reference"

    print("KERNEL_OK")
</pallas_src>

<mosaic_0001>
module attributes {stable_mosaic.version = 11 : i64} {
  func.func @mil_kernel(%arg0: i32, %arg1: memref<3x8x49xf32, #tpu.memory_space<vmem>>, %arg2: memref<16x3xf32, #tpu.memory_space<vmem>>, %arg3: memref<128x128xbf16, #tpu.memory_space<vmem>>, %arg4: memref<1x128xf32, #tpu.memory_space<vmem>>, %arg5: memref<8x128xf32, #tpu.memory_space<vmem>>, %arg6: memref<128x128xf32, #tpu.memory_space<vmem>>) attributes {dimension_semantics = [#tpu.dimension_semantics<parallel>], iteration_bounds = array<i64: 2>, scalar_prefetch = 0 : i64, scratch_operands = 1 : i64, tpu.core_type = #tpu.core_type<tc>, window_params = [{transform_indices = @transform_0, window_bounds = array<i64: 3, 8, 49>}, {pipeline_mode = #tpu.pipeline_mode<synchronous>, transform_indices = @transform_1, window_bounds = array<i64: 16, 3>}, {pipeline_mode = #tpu.pipeline_mode<synchronous>, transform_indices = @transform_2, window_bounds = array<i64: 128, 128>}, {pipeline_mode = #tpu.pipeline_mode<synchronous>, transform_indices = @transform_3, window_bounds = array<i64: 1, 128>}, {transform_indices = @transform_4, window_bounds = array<i64: 8, 128>}]} {
    %c0 = arith.constant 0 : index
    %c0_0 = arith.constant 0 : index
    %0 = vector.load %arg2[%c0, %c0_0] : memref<16x3xf32, #tpu.memory_space<vmem>>, vector<16x3xf32>
    %1 = vector.extract_strided_slice %0 {offsets = [0, 0], sizes = [16, 1], strides = [1, 1]} : vector<16x3xf32> to vector<16x1xf32>
    %2 = vector.shape_cast %1 : vector<16x1xf32> to vector<1x16x1xf32>
    %c0_1 = arith.constant 0 : index
    %c0_2 = arith.constant 0 : index
    %c0_3 = arith.constant 0 : index
    %3 = vector.load %arg1[%c0_1, %c0_2, %c0_3] : memref<3x8x49xf32, #tpu.memory_space<vmem>>, vector<1x8x49xf32>
    %4 = vector.shape_cast %3 : vector<1x8x49xf32> to vector<8x49xf32>
    %5 = vector.shape_cast %4 : vector<8x49xf32> to vector<8x1x49xf32>
    %6 = vector.broadcast %2 : vector<1x16x1xf32> to vector<8x16x49xf32>
    %7 = vector.broadcast %5 : vector<8x1x49xf32> to vector<8x16x49xf32>
    %8 = arith.mulf %6, %7 : vector<8x16x49xf32>
    %9 = vector.extract_strided_slice %0 {offsets = [0, 1], sizes = [16, 1], strides = [1, 1]} : vector<16x3xf32> to vector<16x1xf32>
    %10 = vector.shape_cast %9 : vector<16x1xf32> to vector<1x16x1xf32>
    %c1 = arith.constant 1 : index
    %c0_4 = arith.constant 0 : index
    %c0_5 = arith.constant 0 : index
    %11 = vector.load %arg1[%c1, %c0_4, %c0_5] : memref<3x8x49xf32, #tpu.memory_space<vmem>>, vector<1x8x49xf32>
    %12 = vector.shape_cast %11 : vector<1x8x49xf32> to vector<8x49xf32>
    %13 = vector.shape_cast %12 : vector<8x49xf32> to vector<8x1x49xf32>
    %14 = vector.broadcast %10 : vector<1x16x1xf32> to vector<8x16x49xf32>
    %15 = vector.broadcast %13 : vector<8x1x49xf32> to vector<8x16x49xf32>
    %16 = arith.mulf %14, %15 : vector<8x16x49xf32>
    %17 = arith.addf %8, %16 : vector<8x16x49xf32>
    %18 = vector.extract_strided_slice %0 {offsets = [0, 2], sizes = [16, 1], strides = [1, 1]} : vector<16x3xf32> to vector<16x1xf32>
    %19 = vector.shape_cast %18 : vector<16x1xf32> to vector<1x16x1xf32>
    %c2 = arith.constant 2 : index
    %c0_6 = arith.constant 0 : index
    %c0_7 = arith.constant 0 : index
    %20 = vector.load %arg1[%c2, %c0_6, %c0_7] : memref<3x8x49xf32, #tpu.memory_space<vmem>>, vector<1x8x49xf32>
    %21 = vector.shape_cast %20 : vector<1x8x49xf32> to vector<8x49xf32>
    %22 = vector.shape_cast %21 : vector<8x49xf32> to vector<8x1x49xf32>
    %23 = vector.broadcast %19 : vector<1x16x1xf32> to vector<8x16x49xf32>
    %24 = vector.broadcast %22 : vector<8x1x49xf32> to vector<8x16x49xf32>
    %25 = arith.mulf %23, %24 : vector<8x16x49xf32>
    %26 = arith.addf %17, %25 : vector<8x16x49xf32>
    %cst = arith.constant 0.000000e+00 : f32
    %27 = vector.broadcast %cst : f32 to vector<8x16x49xf32>
    %28 = arith.maximumf %26, %27 : vector<8x16x49xf32>
    %cst_8 = arith.constant 0.000000e+00 : f32
    %29 = vector.broadcast %cst_8 : f32 to vector<128x128xf32>
    %c0_9 = arith.constant 0 : index
    %c0_10 = arith.constant 0 : index
    %30 = vector.load %arg6[%c0_9, %c0_10] : memref<128x128xf32, #tpu.memory_space<vmem>>, vector<128x128xf32>
    tpu.vector_store %arg6[%c0_9, %c0_10], %29 {strides = array<i32>} : memref<128x128xf32, #tpu.memory_space<vmem>>, vector<128x128xf32>,
    %31 = vector.shape_cast %28 : vector<8x16x49xf32> to vector<128x49xf32>
    %c0_11 = arith.constant 0 : index
    %c0_12 = arith.constant 0 : index
    %32 = vector.load %arg6[%c0_11, %c0_12] : memref<128x128xf32, #tpu.memory_space<vmem>>, vector<128x49xf32>
    tpu.vector_store %arg6[%c0_11, %c0_12], %31 {strides = array<i32>} : memref<128x128xf32, #tpu.memory_space<vmem>>, vector<128x49xf32>,
    %c0_13 = arith.constant 0 : index
    %c0_14 = arith.constant 0 : index
    %33 = vector.load %arg6[%c0_13, %c0_14] : memref<128x128xf32, #tpu.memory_space<vmem>>, vector<128x128xf32>
    %34 = arith.truncf %33 : vector<128x128xf32> to vector<128x128xbf16>
    %c0_15 = arith.constant 0 : index
    %c0_16 = arith.constant 0 : index
    %35 = vector.load %arg3[%c0_15, %c0_16] : memref<128x128xbf16, #tpu.memory_space<vmem>>, vector<128x128xbf16>
    %cst_17 = arith.constant dense<0.000000e+00> : vector<128x128xf32>
    %36 = tpu.matmul %34, %35, %cst_17 {dimension_numbers = #tpu.dot_dimension_numbers<[1], [0], [0], [1], [0, 0, 1, 1], [], []>} : vector<128x128xbf16>, vector<128x128xbf16>, vector<128x128xf32> -> vector<128x128xf32>
    %c0_18 = arith.constant 0 : index
    %c0_19 = arith.constant 0 : index
    %37 = vector.load %arg4[%c0_18, %c0_19] : memref<1x128xf32, #tpu.memory_space<vmem>>, vector<1x128xf32>
    %38 = vector.broadcast %37 : vector<1x128xf32> to vector<128x128xf32>
    %39 = arith.addf %36, %38 : vector<128x128xf32>
    %cst_20 = arith.constant dense<0xFF800000> : vector<128xf32>
    %40 = vector.multi_reduction <maximumf>, %39, %cst_20 [1] : vector<128x128xf32> to vector<128xf32>
    %41 = vector.shape_cast %40 : vector<128xf32> to vector<128x1xf32>
    %42 = vector.broadcast %41 : vector<128x1xf32> to vector<128x128xf32>
    %43 = arith.subf %39, %42 : vector<128x128xf32>
    %44 = math.exp %43 : vector<128x128xf32>
    %cst_21 = arith.constant dense<0.000000e+00> : vector<128xf32>
    %45 = vector.multi_reduction <add>, %44, %cst_21 [1] : vector<128x128xf32> to vector<128xf32>
    %46 = vector.shape_cast %45 : vector<128xf32> to vector<128x1xf32>
    %47 = math.log %46 : vector<128x1xf32>
    %48 = vector.broadcast %47 : vector<128x1xf32> to vector<128x128xf32>
    %49 = arith.subf %43, %48 : vector<128x128xf32>
    %50 = vector.shape_cast %49 : vector<128x128xf32> to vector<8x16x128xf32>
    %cst_22 = arith.constant dense<0xFF800000> : vector<8x128xf32>
    %51 = vector.multi_reduction <maximumf>, %50, %cst_22 [1] : vector<8x16x128xf32> to vector<8x128xf32>
    %c0_23 = arith.constant 0 : index
    %c0_24 = arith.constant 0 : index
    %52 = vector.load %arg5[%c0_23, %c0_24] : memref<8x128xf32, #tpu.memory_space<vmem>>, vector<8x128xf32>
    tpu.vector_store %arg5[%c0_23, %c0_24], %51 {strides = array<i32>} : memref<8x128xf32, #tpu.memory_space<vmem>>, vector<8x128xf32>,
    return
  }
  func.func @transform_0(%arg0: i32) -> (i32, i32, i32) {
    %c0_i32 = arith.constant 0 : i32
    %c0_i32_0 = arith.constant 0 : i32
    %c0_i32_1 = arith.constant 0 : i32
    return %c0_i32, %arg0, %c0_i32_0 : i32, i32, i32
  }
  func.func @transform_1(%arg0: i32) -> (i32, i32) {
    %c0_i32 = arith.constant 0 : i32
    %c0_i32_0 = arith.constant 0 : i32
    %c0_i32_1 = arith.constant 0 : i32
    return %c0_i32, %c0_i32_0 : i32, i32
  }
  func.func @transform_2(%arg0: i32) -> (i32, i32) {
    %c0_i32 = arith.constant 0 : i32
    %c0_i32_0 = arith.constant 0 : i32
    %c0_i32_1 = arith.constant 0 : i32
    return %c0_i32, %c0_i32_0 : i32, i32
  }
  func.func @transform_3(%arg0: i32) -> (i32, i32) {
    %c0_i32 = arith.constant 0 : i32
    %c0_i32_0 = arith.constant 0 : i32
    %c0_i32_1 = arith.constant 0 : i32
    return %c0_i32, %c0_i32_0 : i32, i32
  }
  func.func @transform_4(%arg0: i32) -> (i32, i32) {
    %c0_i32 = arith.constant 0 : i32
    %c0_i32_0 = arith.constant 0 : i32
    return %arg0, %c0_i32 : i32, i32
  }
}

</mosaic_0001>

<bundles_post_ra>
// kernel: resnet_mil_forward.1
= control target key start
LH: loop header
LB: loop body
LE: loop exit
PB: predicated region body
PF: predicated region fallthrough
CT: control target
= control target key end

     0   :  { %9 = vsyncpa [#allocation5], 0  ;;  %s1786_s0 = inlined_call_operand.vmem [shape: f32[3,16,49], index: 0, kind: input, shape index: {}]   ;;  %s1787_s1 = inlined_call_operand.vmem [shape: f32[16,3], index: 1, kind: input, shape index: {}]   ;;  %s1788_s2 = inlined_call_operand.vmem [shape: bf16[128,128], index: 2, kind: input, shape index: {}]   ;;  %s1789_s3 = inlined_call_operand.vmem [shape: f32[1,128], index: 3, kind: input, shape index: {}]   ;;  %s1790_s4 = inlined_call_operand.hbm [shape: f32[16,128], index: 4, kind: output, shape index: {}]  }
   0x1   :  { %11 = vsyncpa [#allocation5 + $0x1], 0  ;;  %s1487_s15 = smov 0   ;;  %s1489_s16 = smov 0  }
   0x2   :  { %s1491_s17 = smov 0   ;;  %s1493_s18 = smov 0  }
   0x3 LB: > { %s1181_s19 = sadd.s32 4294967295, %s1454_s18   ;;  %s1182_s20 = sadd.s32 4294967294, %s1454_s18   ;;  %s1454_s18 = sphi %s1493_s18, %s1796_s18   ;;  %s1450_s17 = sphi %s1491_s17, %s1795_s17   ;;  %s1446_s16 = sphi %s1489_s16, %s1794_s16   ;;  %s1442_s15 = sphi %s1487_s15, %s1793_s15  }
   0x4   : > { %s1510_s21 = sadd.s32 1, %s1454_s18   ;;  %s24_s22 = sadd.s32 1, %s1450_s17 }
   0x5   : > { %s21_s23 = ssub.s32 %s1454_s18, %s1510_s21  ;;  %p31_p0 = scmp.ne.s32.totalorder %s1450_s17, %s1446_s16 }
   0x6   : > { %p22_p1 = scmp.eq.s32.totalorder %s21_s23, 0  ;;  %p32_p2 = scmp.eq.s32.totalorder %s1454_s18, 0 }
   0x7   : > { %p124_p3 = scmp.eq.s32.totalorder %s1181_s19, 1  ;;  %p129_p4 = scmp.ne.s32.totalorder %s1446_s16, %s1442_s15 }
   0x8   : > { %s1523_s24 = scalar_select %p22_p1, %s1450_s17, %s24_s22  }
   0x9   : > { %p33_p5 = por %p32_p2, %p31_p0  ;;  %p1525_p6 = por %p124_p3, %p31_p0 }
   0xa   : > { %p130_p7 = scmp.eq.s32.totalorder %s1182_s20, 1  ;;  %p1184_p9 = scmp.ge.s32.totalorder %s1454_s18, 2 }
   0xc   : > { %p1529_p8 = por %p130_p7, %p129_p4  ;;  %155 = sbr.rel (%p1184_p9) target bundleno = 26 (0x1a), region = 28 }
  0x13   : > { %158 = sbr.rel (!%p33_p5) target bundleno = 26 (0x1a), region = 32  ;;  %s160_s27 = sand.u32 (%p33_p5), 1, %s1450_s17  }
  0x14   : > { %s1185_s28 = sshll.u32 (%p33_p5), %s1454_s18, 3  ;;  %s1267_s29 = smul.u32 (%p33_p5), 24, %s160_s27 }
  0x15   : > { %s164_s6 = scalar_lea.vmem (%p33_p5), %s1786_s0, %s1185_s28 }
  0x16   : > { %v196_v0 = vld [vmem:[%s164_s6] sm:$0xff] (%p33_p5)  ;;  %v198_v1 = vld [vmem:[%s164_s6 + $0x10] sm:$0xff] (%p33_p5)  ;;  %s162_s7 = scalar_lea.vmem (%p33_p5), [#allocation3], %s1267_s29 }
  0x17   : > { %v200_v2 = vld [vmem:[%s164_s6 + $0x20] sm:$0xff] (%p33_p5)  ;;  %197 = vst [vmem:[%s162_s7] sm:$0xff] (%p33_p5), %v196_v0  ;;  %199 = vst [vmem:[%s162_s7 + $0x8] sm:$0xff] (%p33_p5), %v198_v1 }
  0x18   : > { %201 = vst [vmem:[%s162_s7 + $0x10] sm:$0xff] (%p33_p5), %v200_v2 }
  0x1a PF: > { %p1186_p10 = scmp.ge.s32.totalorder %s1454_s18, 1  ;;  %p206_p11 = scmp.lt.s32.totalorder %s1454_s18, 3 }
  0x1c   : > { %p207_p12 = pnand %p1186_p10, %p206_p11 }
  0x1d   : > { %v239_v3 = vld [vmem:[%s1787_s1] sm:$0xff] (!%p207_p12)  ;;  %v1456_v5 = vmov (!%p207_p12), 1   ;;  %v1457_v6 = vmov (!%p207_p12), 0   ;;  %v1318_v7 = vld [vmem:[%s1788_s2 + $0x8] sm:$0xff] (!%p207_p12)   ;;  %v1321_v9 = vld [vmem:[%s1788_s2 + $0x10] sm:$0xff] (!%p207_p12)   ;;  %v1458_v10 = vmov (!%p207_p12), 2   ;;  %v247_v19 = vlaneseq (!%p207_p12) }
  0x1e   : > { %210 = sbr.rel (%p207_p12) target bundleno = 785 (0x311), region = 70  ;;  %v1317_v4 = vld [vmem:[%s1788_s2] sm:$0xff] (!%p207_p12)   ;;  %1314 = vset.pattern.permute.xlu1 (!%p207_p12), %v1456_v5  ;;  %1313 = vset.pattern.permute.xlu0 (!%p207_p12), %v1457_v6  ;;  %v240_v8 = vld [vmem:[%s1787_s1 + $0x8] sm:$0xff] (!%p207_p12)  ;;  %v1322_v11 = vld [vmem:[%s1788_s2 + $0x18] sm:$0xff] (!%p207_p12)   ;;  %v1459_v13 = vmov (!%p207_p12), 0.0   ;;  %s1574_s11 = sand.u32 (!%p207_p12), 1, %s1446_s16  }
  0x1f   : > { %411 = vperm.xlu1 (!%p207_p12), %1314, %v239_v3   ;;  %294 = vperm.xlu0 (!%p207_p12), %1313, %v239_v3   ;;  %v1324_v12 = vld [vmem:[%s1788_s2 + $0x20] sm:$0xff] (!%p207_p12)   ;;  %639 = vst [vmem:[#allocation2 + $0x8] sm:$0xff] (!%p207_p12), %v1459_v13  ;;  %641 = vst [vmem:[#allocation2 + $0x18] sm:$0xff] (!%p207_p12), %v1459_v13  ;;  %v1325_v14 = vld [vmem:[%s1788_s2 + $0x28] sm:$0xff] (!%p207_p12)   ;;  %s1268_s12 = smul.u32 (!%p207_p12), 24, %s1574_s11  ;;  %v248_v21 = vshrl.u32 (!%p207_p12), %v247_v19, 7 }
  0x20   : > { %1219 = vmatprep.subr.bf16.mxu0 (!%p207_p12), %v1317_v4  ;;  %1251 = vmatprep.subr.bf16.mxu1 (!%p207_p12), %v1317_v4  ;;  %643 = vst [vmem:[#allocation2 + $0x28] sm:$0xff] (!%p207_p12), %v1459_v13  ;;  %645 = vst [vmem:[#allocation2 + $0x38] sm:$0xff] (!%p207_p12), %v1459_v13  ;;  %v1326_v15 = vld [vmem:[%s1788_s2 + $0x30] sm:$0xff] (!%p207_p12)   ;;  %v1327_v16 = vld [vmem:[%s1788_s2 + $0x38] sm:$0xff] (!%p207_p12)   ;;  %v1460_v17 = vmov (!%p207_p12), 1966171168  }
  0x21   : > { %1220 = vmatpush3.bf16.msra.mxu0 (!%p207_p12), %v1317_v4  ;;  %1259 = vmatpush3.bf16.msra.mxu1 (!%p207_p12), %v1317_v4  ;;  %647 = vst [vmem:[#allocation2 + $0x48] sm:$0xff] (!%p207_p12), %v1459_v13  ;;  %649 = vst [vmem:[#allocation2 + $0x58] sm:$0xff] (!%p207_p12), %v1459_v13  ;;  %v245_v18 = vunpack.c.l.s4 (!%p207_p12), %v1460_v17  ;;  %s215_s13 = scalar_lea.vmem (!%p207_p12), [#allocation3], %s1268_s12  ;;  %v304_v45 = vsub.s32 (!%p207_p12), 0, %v248_v21  ;;  %vm654_vm0 = vcmask (!%p207_p12), 400384   ;;  %vm1087_vm1 = vcmask (!%p207_p12), 1041409  }
  0x22   : > { %1221 = vmatprep.subr.bf16.mxu0 (!%p207_p12), %v1318_v7  ;;  %1252 = vmatprep.subr.bf16.mxu1 (!%p207_p12), %v1318_v7  ;;  %651 = vst [vmem:[#allocation2 + $0x68] sm:$0xff] (!%p207_p12), %v1459_v13  ;;  %653 = vst [vmem:[#allocation2 + $0x78] sm:$0xff] (!%p207_p12), %v1459_v13  ;;  %v1188_v22 = vld [vmem:[%s215_s13 + $0x8] sm:$0xff] (!%p207_p12)  ;;  %v241_v24 = vld [vmem:[%s215_s13] sm:$0xff] (!%p207_p12)  ;;  %vm1089_vm2 = vcmask (!%p207_p12), 1042434   ;;  %s1187_s22 = sshll.u32 (!%p207_p12), %s1574_s11, 3 }
  0x23   : > { %415 = vperm.xlu1 (!%p207_p12), %1314, %v240_v8   ;;  %299 = vperm.xlu0 (!%p207_p12), %1313, %v240_v8   ;;  %638 = vst [vmem:[#allocation2] sm:$0xff] (!%p207_p12), %v1459_v13  ;;  %640 = vst [vmem:[#allocation2 + $0x10] sm:$0xff] (!%p207_p12), %v1459_v13  ;;  %v246_v20 = vunpack.c.0.s8 (!%p207_p12), %v245_v18  ;;  %v361_v25 = vcombine.high (!%p207_p12), %v1188_v22, %v1188_v22  ;;  %v1189_v26 = vld [vmem:[%s215_s13 + $0x10] sm:$0xff] (!%p207_p12)  ;;  %v243_v27 = vcombine.high (!%p207_p12), %v241_v24, %v241_v24  ;;  %vm1091_vm3 = vcmask (!%p207_p12), 1043459   ;;  %s1200_s23 = sshll.u32 (!%p207_p12), %s1181_s19, 7  ;;  %s237_s27 = scalar_lea.vmem (!%p207_p12), [#allocation4], %s1187_s22 }
  0x24   : > { %642 = vst [vmem:[#allocation2 + $0x20] sm:$0xff] (!%p207_p12), %v1459_v13  ;;  %644 = vst [vmem:[#allocation2 + $0x30] sm:$0xff] (!%p207_p12), %v1459_v13  ;;  %v493_v30 = vcombine.high (!%p207_p12), %v1189_v26, %v1189_v26  ;;  %vm1093_vm4 = vcmask (!%p207_p12), 1044484   ;;  %vm1095_vm5 = vcmask (!%p207_p12), 1045509   ;;  %vm1097_vm6 = vcmask (!%p207_p12), 1046534   ;;  %s1117_s28 = sshll.u32 (!%p207_p12), %s237_s27, 4  ;;  %s1742_s5 = scalar_lea.hbm (!%p207_p12), %s1790_s4, %s1200_s23  ;;  %s1744_s28 = int_to_ptr.vmem [resolvable:$true] %s1117_s28 }
  0x25   : > { %1222 = vmatpush3.bf16.msra.mxu0 %v1318_v7  ;;  %1260 = vmatpush3.bf16.msra.mxu1 %v1318_v7  ;;  %646 = vst [vmem:[#allocation2 + $0x40] sm:$0xff] %v1459_v13  ;;  %648 = vst [vmem:[#allocation2 + $0x50] sm:$0xff] %v1459_v13  ;;  %v249_v23 = vsub.s32 %v246_v20, %v248_v21  ;;  %vm1099_vm7 = vcmask 1047559   ;;  %s1104_s6 = scalar_lea.sflag [#allocation5], %s1574_s11  ;;  %s1392_s19 = scalar_lea.vmem %s1744_s28, 128 }
  0x26   : > { %1223 = vmatprep.subr.bf16.mxu0 %v1321_v9  ;;  %1253 = vmatprep.subr.bf16.mxu1 %v1321_v9  ;;  %650 = vst [vmem:[#allocation2 + $0x60] sm:$0xff] %v1459_v13  ;;  %652 = vst [vmem:[#allocation2 + $0x70] sm:$0xff] %v1459_v13  ;;  %p1393_p13 = scmp.ne.s32.totalorder %s1744_s28, %s1392_s19  ;;  %s1461_s7 = smov [#allocation4]  }
  0x27   : > { %1316 = vset.pattern.permute.xlu1 %v1458_v10  ;;  %1315 = vset.pattern.permute.xlu0 %v1458_v10  ;;  %v368_v28 = vrot.slane %v1188_v22, %v249_v23  ;;  %v375_v29 = vrot.slane %v361_v25, %v249_v23  ;;  %v250_v31 = vrot.slane %v241_v24, %v249_v23  ;;  %s1396_s8 = sshll.u32 %s1461_s7, 4  ;;  %s1397_s8 = int_to_ptr.vmem [resolvable:$false] %s1396_s8 }
  0x28   : > { %547 = vperm.xlu1 %1316, %v240_v8   ;;  %543 = vperm.xlu0 %1315, %v239_v3   ;;  %v257_v32 = vrot.slane %v243_v27, %v249_v23  ;;  %v500_v35 = vrot.slane %v1189_v26, %v249_v23  ;;  %v507_v36 = vrot.slane %v493_v30, %v249_v23  ;;  %p1394_p0 = pnand %p1393_p13, %p1525_p6  ;;  %s1398_s9 = scalar_lea.vmem %s1397_s8, 256 }
  0x29   : > { %1224 = vmatpush3.bf16.msra.mxu0 %v1321_v9  ;;  %1261 = vmatpush3.bf16.msra.mxu1 %v1321_v9  ;;  %v376_v33 = vcombine.high %v368_v28, %v368_v28  ;;  %v377_v34 = vcombine.high %v375_v29, %v375_v29  ;;  %v258_v37 = vcombine.high %v250_v31, %v250_v31  ;;  %p1399_p2 = scmp.lt.s32.totalorder %s1744_s28, %s1397_s8  ;;  %p1400_p3 = scmp.lt.s32.totalorder %s1398_s9, %s1392_s19 }
  0x2a   : > { %1225 = vmatprep.subr.bf16.mxu0 %v1322_v11  ;;  %1254 = vmatprep.subr.bf16.mxu1 %v1322_v11  ;;  %v384_v38 = vrot.slane %v368_v28, %v249_v23  ;;  %v259_v39 = vcombine.high %v257_v32, %v257_v32  ;;  %v391_v40 = vrot.slane %v375_v29, %v249_v23  ;;  %p1395_p1 = pneg %p1394_p0 }
  0x2b   : > { %v398_v41 = vrot.slane %v376_v33, %v249_v23  ;;  %v405_v42 = vrot.slane %v377_v34, %v249_v23  ;;  %v508_v43 = vcombine.high %v500_v35, %v500_v35  ;;  %v509_v44 = vcombine.high %v507_v36, %v507_v36  ;;  %p1401_p4 = por %p1400_p3, %p1399_p2 }
  0x2c   : > { %v266_v46 = vrot.slane %v250_v31, %v249_v23  ;;  %v280_v47 = vrot.slane %v258_v37, %v249_v23  ;;  %v406_v48 = vcombine.high %v384_v38, %v384_v38  ;;  %v273_v49 = vrot.slane %v257_v32, %v249_v23 }
  0x2d   : > { %1226 = vmatpush3.bf16.msra.mxu0 %v1322_v11  ;;  %1262 = vmatpush3.bf16.msra.mxu1 %v1322_v11  ;;  %v287_v50 = vrot.slane %v259_v39, %v249_v23  ;;  %v407_v51 = vcombine.high %v391_v40, %v391_v40  ;;  %v408_v52 = vcombine.high %v398_v41, %v398_v41  ;;  %p1402_p5 = pnand %p1401_p4, %p1395_p1 }
  0x2e   : > { %1227 = vmatprep.subr.bf16.mxu0 %v1324_v12  ;;  %1255 = vmatprep.subr.bf16.mxu1 %v1324_v12  ;;  %v516_v53 = vrot.slane %v500_v35, %v249_v23  ;;  %v409_v54 = vcombine.high %v405_v42, %v405_v42  ;;  %v523_v55 = vrot.slane %v507_v36, %v249_v23 }
  0x2f   : > { %v530_v56 = vrot.slane %v508_v43, %v249_v23  ;;  %v537_v57 = vrot.slane %v509_v44, %v249_v23  ;;  %v421_v58 = vrot.slane %v384_v38, %v304_v45  ;;  %v1577_v59 = vrot.slane %v391_v40, %v304_v45 }
  0x30   : > { %v288_v60 = vcombine.high %v266_v46, %v266_v46  ;;  %v290_v61 = vcombine.high %v280_v47, %v280_v47  ;;  %v425_v62 = vrot.slane %v398_v41, %v304_v45  ;;  %v429_v63 = vrot.slane %v406_v48, %v304_v45 }
  0x31   : > { %1228 = vmatpush3.bf16.msra.mxu0 %v1324_v12  ;;  %1263 = vmatpush3.bf16.msra.mxu1 %v1324_v12  ;;  %v289_v0 = vcombine.high %v273_v49, %v273_v49  ;;  %v291_v1 = vcombine.high %v287_v50, %v287_v50  ;;  %v433_v2 = vrot.slane %v408_v52, %v304_v45 }
  0x32   : > { %1229 = vmatprep.subr.bf16.mxu0 %v1325_v14  ;;  %1256 = vmatprep.subr.bf16.mxu1 %v1325_v14  ;;  %v441_v3 = vrot.slane %v405_v42, %v304_v45  ;;  %v445_v4 = vrot.slane %v407_v51, %v304_v45  ;;  %v538_v5 = vcombine.high %v516_v53, %v516_v53 }
  0x33   : > { %v449_v6 = vrot.slane %v409_v54, %v304_v45  ;;  %v539_v7 = vcombine.high %v523_v55, %v523_v55  ;;  %v540_v8 = vcombine.high %v530_v56, %v530_v56  ;;  %v541_v9 = vcombine.high %v537_v57, %v537_v57 }
  0x34   : > { %v305_v10 = vrot.slane %v266_v46, %v304_v45  ;;  %v309_v11 = vrot.slane %v280_v47, %v304_v45  ;;  %v313_v12 = vrot.slane %v288_v60, %v304_v45  ;;  %v317_v13 = vrot.slane %v290_v61, %v304_v45 }
  0x35   : > { %1230 = vmatpush3.bf16.msra.mxu0 %v1325_v14  ;;  %1264 = vmatpush3.bf16.msra.mxu1 %v1325_v14  ;;  %v321_v14 = vrot.slane %v273_v49, %v304_v45  ;;  %v333_v17 = vrot.slane %v291_v1, %v304_v45  ;;  %v1579_v18 = vrot.slane %v516_v53, %v304_v45 }
  0x36   : > { %1231 = vmatprep.subr.bf16.mxu0 %v1326_v15  ;;  %1257 = vmatprep.subr.bf16.mxu1 %v1326_v15  ;;  %v1581_v19 = vrot.slane %v530_v56, %v304_v45  ;;  %v1583_v20 = vrot.slane %v538_v5, %v304_v45  ;;  %v1585_v21 = vrot.slane %v523_v55, %v304_v45 }
  0x37   : > { %v1587_v24 = vrot.slane %v540_v8, %v304_v45  ;;  %v1589_v25 = vrot.slane %v537_v57, %v304_v45  ;;  %v1591_v26 = vrot.slane %v539_v7, %v304_v45  ;;  %v1593_v27 = vrot.slane %v541_v9, %v304_v45 }
  0x39   : > { %1232 = vmatpush3.bf16.msra.mxu0 %v1326_v15  ;;  %1265 = vmatpush3.bf16.msra.mxu1 %v1326_v15  ;;  %v325_v15 = vrot.slane %v287_v50, %v304_v45 }
  0x3a   : > { %1233 = vmatprep.subr.bf16.mxu0 %v1327_v16  ;;  %1258 = vmatprep.subr.bf16.mxu1 %v1327_v16 }
  0x3d   : > { %1234 = vmatpush3.bf16.msra.mxu0 %v1327_v16  ;;  %1266 = vmatpush3.bf16.msra.mxu1 %v1327_v16  ;;  %v329_v16 = vrot.slane %v289_v0, %v304_v45 }
  0x9e   : > { %v412_v22 = vpop.permute.xlu1 %411  ;;  %v295_v23 = vpop.permute.xlu0 %294 }
  0x9f   : > { %v458_v28 = vmul.f32 %v421_v58, %v412_v22  ;;  %v460_v29 = vmul.f32 %v425_v62, %v412_v22  ;;  %v462_v30 = vmul.f32 %v429_v63, %v412_v22  ;;  %v464_v31 = vmul.f32 %v433_v2, %v412_v22 }
  0xa0   : > { %v466_v32 = vmul.f32 %v1577_v59, %v412_v22  ;;  %v468_v33 = vmul.f32 %v441_v3, %v412_v22  ;;  %v470_v34 = vmul.f32 %v445_v4, %v412_v22  ;;  %v472_v35 = vmul.f32 %v449_v6, %v412_v22 }
  0xa1   : > { %v342_v36 = vmul.f32 %v305_v10, %v295_v23  ;;  %v344_v37 = vmul.f32 %v309_v11, %v295_v23  ;;  %v346_v38 = vmul.f32 %v313_v12, %v295_v23  ;;  %v348_v39 = vmul.f32 %v317_v13, %v295_v23 }
  0xa2   : > { %v350_v40 = vmul.f32 %v321_v14, %v295_v23  ;;  %v352_v41 = vmul.f32 %v325_v15, %v295_v23  ;;  %v354_v42 = vmul.f32 %v329_v16, %v295_v23  ;;  %v356_v43 = vmul.f32 %v333_v17, %v295_v23  ;;  %v416_v44 = vpop.permute.xlu1 %415  ;;  %v300_v53 = vpop.permute.xlu0 %299 }
  0xa3   : > { %v1596_v45 = vadd.f32 %v458_v28, %v342_v36  ;;  %v1598_v46 = vadd.f32 %v460_v29, %v344_v37  ;;  %v1600_v47 = vadd.f32 %v462_v30, %v346_v38  ;;  %v1602_v48 = vadd.f32 %v464_v31, %v348_v39 }
  0xa4   : > { %v1604_v49 = vadd.f32 %v466_v32, %v350_v40  ;;  %v1606_v50 = vadd.f32 %v468_v33, %v352_v41  ;;  %v1608_v51 = vadd.f32 %v470_v34, %v354_v42  ;;  %v1610_v52 = vadd.f32 %v472_v35, %v356_v43 }
  0xa5   : > { %v459_v54 = vmul.f32 %v421_v58, %v416_v44  ;;  %v461_v55 = vmul.f32 %v425_v62, %v416_v44  ;;  %v463_v56 = vmul.f32 %v429_v63, %v416_v44  ;;  %v465_v57 = vmul.f32 %v433_v2, %v416_v44 }
  0xa6   : > { %v467_v60 = vmul.f32 %v1577_v59, %v416_v44  ;;  %v469_v61 = vmul.f32 %v441_v3, %v416_v44  ;;  %v471_v0 = vmul.f32 %v445_v4, %v416_v44  ;;  %v473_v1 = vmul.f32 %v449_v6, %v416_v44 }
  0xa7   : > { %v343_v5 = vmul.f32 %v305_v10, %v300_v53  ;;  %v345_v7 = vmul.f32 %v309_v11, %v300_v53  ;;  %v347_v8 = vmul.f32 %v313_v12, %v300_v53  ;;  %v349_v9 = vmul.f32 %v317_v13, %v300_v53  ;;  %v548_v30 = vpop.permute.xlu1 %547  ;;  %v544_v39 = vpop.permute.xlu0 %543 }
  0xa8   : > { %v351_v22 = vmul.f32 %v321_v14, %v300_v53  ;;  %v353_v23 = vmul.f32 %v325_v15, %v300_v53  ;;  %v355_v28 = vmul.f32 %v329_v16, %v300_v53  ;;  %v357_v29 = vmul.f32 %v333_v17, %v300_v53 }
  0xa9   : > { %v475_v31 = vadd.f32 %v459_v54, %v343_v5  ;;  %v477_v58 = vadd.f32 %v461_v55, %v345_v7  ;;  %v479_v62 = vadd.f32 %v463_v56, %v347_v8  ;;  %v481_v63 = vadd.f32 %v465_v57, %v349_v9 }
  0xaa   : > { %v483_v2 = vadd.f32 %v467_v60, %v351_v22  ;;  %v485_v32 = vadd.f32 %v469_v61, %v353_v23  ;;  %v487_v59 = vadd.f32 %v471_v0, %v355_v28  ;;  %v489_v3 = vadd.f32 %v473_v1, %v357_v29 }
  0xab   : > { %v591_v4 = vmul.f32 %v1579_v18, %v548_v30  ;;  %v593_v6 = vmul.f32 %v1581_v19, %v548_v30  ;;  %v595_v10 = vmul.f32 %v1583_v20, %v548_v30  ;;  %v597_v11 = vmul.f32 %v1587_v24, %v548_v30 }
  0xac   : > { %v599_v12 = vmul.f32 %v1585_v21, %v548_v30  ;;  %v601_v13 = vmul.f32 %v1589_v25, %v548_v30  ;;  %v603_v14 = vmul.f32 %v1591_v26, %v548_v30  ;;  %v605_v15 = vmul.f32 %v1593_v27, %v548_v30 }
  0xad   : > { %v607_v16 = vadd.f32 %v591_v4, %v475_v31  ;;  %v609_v17 = vadd.f32 %v593_v6, %v477_v58  ;;  %v611_v33 = vadd.f32 %v595_v10, %v479_v62  ;;  %v613_v34 = vadd.f32 %v597_v11, %v481_v63 }
  0xae   : > { %v615_v35 = vadd.f32 %v599_v12, %v483_v2  ;;  %v617_v36 = vadd.f32 %v601_v13, %v485_v32  ;;  %v619_v37 = vadd.f32 %v603_v14, %v487_v59  ;;  %v621_v38 = vadd.f32 %v605_v15, %v489_v3 }
  0xaf   : > { %v623_v40 = vmax.f32 %v607_v16, 0.0  ;;  %v625_v41 = vmax.f32 %v609_v17, 0.0  ;;  %v627_v42 = vmax.f32 %v611_v33, 0.0  ;;  %v629_v43 = vmax.f32 %v613_v34, 0.0  ;;  %v1190_v17 = vld [vmem:[%s1789_s3] ss:$0 sm:$0xff] }
  0xb0   : > { %v631_v44 = vmax.f32 %v615_v35, 0.0  ;;  %v633_v53 = vmax.f32 %v617_v36, 0.0  ;;  %v635_v54 = vmax.f32 %v619_v37, 0.0  ;;  %v637_v55 = vmax.f32 %v621_v38, 0.0 }
  0xb1   : > { %656 = vst.msk [vmem:[#allocation2 + $0x8] sm:$0xff] %vm654_vm0, %v623_v40  ;;  %658 = vst.msk [vmem:[#allocation2 + $0x18] sm:$0xff] %vm654_vm0, %v625_v41  ;;  %v590_v56 = vmul.f32 %v1579_v18, %v544_v39  ;;  %v592_v57 = vmul.f32 %v1581_v19, %v544_v39  ;;  %v594_v60 = vmul.f32 %v1583_v20, %v544_v39 }
  0xb2   : > { %660 = vst.msk [vmem:[#allocation2 + $0x28] sm:$0xff] %vm654_vm0, %v627_v42  ;;  %662 = vst.msk [vmem:[#allocation2 + $0x38] sm:$0xff] %vm654_vm0, %v629_v43  ;;  %v596_v61 = vmul.f32 %v1587_v24, %v544_v39  ;;  %v598_v0 = vmul.f32 %v1585_v21, %v544_v39  ;;  %v600_v1 = vmul.f32 %v1589_v25, %v544_v39 }
  0xb3   : > { %664 = vst.msk [vmem:[#allocation2 + $0x48] sm:$0xff] %vm654_vm0, %v631_v44  ;;  %666 = vst.msk [vmem:[#allocation2 + $0x58] sm:$0xff] %vm654_vm0, %v633_v53  ;;  %v602_v18 = vmul.f32 %v1591_v26, %v544_v39  ;;  %v604_v19 = vmul.f32 %v1593_v27, %v544_v39  ;;  %v606_v20 = vadd.f32 %v590_v56, %v1596_v45 }
  0xb4   : > { %668 = vst.msk [vmem:[#allocation2 + $0x68] sm:$0xff] %vm654_vm0, %v635_v54  ;;  %670 = vst.msk [vmem:[#allocation2 + $0x78] sm:$0xff] %vm654_vm0, %v637_v55  ;;  %v608_v24 = vadd.f32 %v592_v57, %v1598_v46  ;;  %v610_v5 = vadd.f32 %v594_v60, %v1600_v47  ;;  %v612_v7 = vadd.f32 %v596_v61, %v1602_v48 }
  0xb5   : > { %v614_v8 = vadd.f32 %v598_v0, %v1604_v49  ;;  %v616_v9 = vadd.f32 %v600_v1, %v1606_v50  ;;  %v618_v21 = vadd.f32 %v602_v18, %v1608_v51  ;;  %v620_v25 = vadd.f32 %v604_v19, %v1610_v52 }
  0xb6   : > { %v622_v22 = vmax.f32 %v606_v20, 0.0  ;;  %v624_v26 = vmax.f32 %v608_v24, 0.0  ;;  %v626_v23 = vmax.f32 %v610_v5, 0.0  ;;  %v628_v27 = vmax.f32 %v612_v7, 0.0 }
  0xb7   : > { %v630_v28 = vmax.f32 %v614_v8, 0.0  ;;  %v632_v45 = vmax.f32 %v616_v9, 0.0  ;;  %v634_v29 = vmax.f32 %v618_v21, 0.0  ;;  %v636_v46 = vmax.f32 %v620_v25, 0.0 }
  0xb8   : > { %655 = vst.msk [vmem:[#allocation2] sm:$0xff] %vm654_vm0, %v622_v22  ;;  %657 = vst.msk [vmem:[#allocation2 + $0x10] sm:$0xff] %vm654_vm0, %v624_v26  ;;  %v672_v47 = vld [vmem:[#allocation2 + $0x8] sm:$0xff]  ;;  %v674_v48 = vld [vmem:[#allocation2 + $0x18] sm:$0xff] }
  0xb9   : > { %659 = vst.msk [vmem:[#allocation2 + $0x20] sm:$0xff] %vm654_vm0, %v626_v23  ;;  %661 = vst.msk [vmem:[#allocation2 + $0x30] sm:$0xff] %vm654_vm0, %v628_v27  ;;  %v676_v49 = vld [vmem:[#allocation2 + $0x28] sm:$0xff]  ;;  %v678_v12 = vld [vmem:[#allocation2 + $0x38] sm:$0xff] }
  0xba   : > { %663 = vst.msk [vmem:[#allocation2 + $0x40] sm:$0xff] %vm654_vm0, %v630_v28  ;;  %665 = vst.msk [vmem:[#allocation2 + $0x50] sm:$0xff] %vm654_vm0, %v632_v45  ;;  %v680_v50 = vld [vmem:[#allocation2 + $0x48] sm:$0xff]  ;;  %v682_v51 = vld [vmem:[#allocation2 + $0x58] sm:$0xff] }
  0xbb   : > { %667 = vst.msk [vmem:[#allocation2 + $0x60] sm:$0xff] %vm654_vm0, %v634_v29  ;;  %669 = vst.msk [vmem:[#allocation2 + $0x70] sm:$0xff] %vm654_vm0, %v636_v46  ;;  %v684_v52 = vld [vmem:[#allocation2 + $0x68] sm:$0xff]  ;;  %v686_v14 = vld [vmem:[#allocation2 + $0x78] sm:$0xff] }
  0xbf   : > { %v671_v30 = vld [vmem:[#allocation2] sm:$0xff]  ;;  %v673_v31 = vld [vmem:[#allocation2 + $0x10] sm:$0xff] }
  0xc0   : > { %v675_v58 = vld [vmem:[#allocation2 + $0x20] sm:$0xff]  ;;  %v687_v62 = vpack.c.bf16 %v672_v47, %v671_v30  ;;  %v688_v2 = vpack.c.bf16 %v674_v48, %v673_v31  ;;  %v677_v11 = vld [vmem:[#allocation2 + $0x30] sm:$0xff] }
  0xc1   : > { %v679_v63 = vld [vmem:[#allocation2 + $0x40] sm:$0xff]  ;;  %v681_v32 = vld [vmem:[#allocation2 + $0x50] sm:$0xff]  ;;  %v689_v6 = vpack.c.bf16 %v676_v49, %v675_v58  ;;  %v690_v15 = vpack.c.bf16 %v678_v12, %v677_v11 }
  0xc2   : > { %v683_v59 = vld [vmem:[#allocation2 + $0x60] sm:$0xff]  ;;  %v691_v3 = vpack.c.bf16 %v680_v50, %v679_v63  ;;  %v692_v4 = vpack.c.bf16 %v682_v51, %v681_v32  ;;  %1235 = vmatprep.mubr.bf16.mxu0 %v687_v62  ;;  %v685_v13 = vld [vmem:[#allocation2 + $0x70] sm:$0xff] }
  0xc3   : > { %1236 = vmatmul.mubr.bf16.vlgmr.msra.gmra.mrb[0].mxu0 %v688_v2  ;;  %v693_v10 = vpack.c.bf16 %v684_v52, %v683_v59  ;;  %v694_v16 = vpack.c.bf16 %v686_v14, %v685_v13 }
  0xc4   : > { %1243 = vmatprep.mubr.bf16.mxu1 %v691_v3  ;;  %1239 = vmatprep.mubr.bf16.mxu0 %v689_v6 }
  0xc5   : > { %1244 = vmatmul.mubr.bf16.vlgmr.msra.gmra.mrb[0].mxu1 %v692_v4 }
  0xc6   : > { %1247 = vmatprep.mubr.bf16.mxu1 %v693_v10 }
  0xcb   : > { %1240 = vmatmul.mubr.bf16.gmra.mrb[4].mxu0 %v690_v15 }
  0xcd   : > { %1248 = vmatmul.mubr.bf16.gmra.mrb[4].mxu1 %v694_v16 }
 0x196   : > { %v1237_v33 = vpop.f32.mrb[0].mxu0 }
 0x197   : > { %v809_v34 = vadd.f32 %v1237_v33, %v1190_v17  ;;  %v800_v36 = vpop.f32.mrb[1].mxu0 }
 0x198   : > { %v1245_v35 = vpop.f32.mrb[0].mxu1  ;;  %v801_v37 = vadd.f32 %v1190_v17, %v800_v36  ;;  %v1238_v39 = vpop.f32.mrb[2].mxu0 }
 0x199   : > { %v832_v38 = vpop.f32.mrb[1].mxu1  ;;  %867 = vmax.xlane.f32.xlu0 %v809_v34  ;;  %v803_v41 = vpop.f32.mrb[3].mxu0  ;;  %v841_v43 = vadd.f32 %v1245_v35, %v1190_v17  ;;  %v812_v44 = vadd.f32 %v1238_v39, %v1190_v17 }
 0x19a   : > { %v1246_v40 = vpop.f32.mrb[2].mxu1  ;;  %863 = vmax.xlane.f32.xlu1 %v801_v37  ;;  %v833_v54 = vadd.f32 %v1190_v17, %v832_v38  ;;  %v804_v19 = vadd.f32 %v1190_v17, %v803_v41 }
 0x19b   : > { %v835_v42 = vpop.f32.mrb[3].mxu1  ;;  %v844_v57 = vadd.f32 %v1246_v40, %v1190_v17 }
 0x19c   : > { %v836_v20 = vadd.f32 %v1190_v17, %v835_v42 }
 0x19d   : > { %883 = vmax.xlane.f32.xlu0 %v841_v43 }
 0x19e   : > { %869 = vmax.xlane.f32.xlu1 %v812_v44  ;;  %v1241_v53 = vpop.f32.mrb[4].mxu0 }
 0x19f   : > { %v816_v56 = vpop.f32.mrb[5].mxu0  ;;  %v825_v24 = vadd.f32 %v1241_v53, %v1190_v17 }
 0x1a0   : > { %v1249_v55 = vpop.f32.mrb[4].mxu1  ;;  %v1242_v61 = vpop.f32.mrb[6].mxu0  ;;  %v817_v7 = vadd.f32 %v1190_v17, %v816_v56 }
 0x1a1   : > { %v848_v60 = vpop.f32.mrb[5].mxu1  ;;  %v819_v1 = vpop.f32.mrb[7].mxu0  ;;  %879 = vmax.xlane.f32.xlu0 %v833_v54  ;;  %v828_v5 = vadd.f32 %v1242_v61, %v1190_v17  ;;  %v1662_v25 = vadd.f32 %v1249_v55, %v1190_v17 }
 0x1a2   : > { %v1250_v0 = vpop.f32.mrb[6].mxu1  ;;  %885 = vmax.xlane.f32.xlu1 %v844_v57  ;;  %v820_v8 = vadd.f32 %v1190_v17, %v819_v1  ;;  %v1656_v9 = vadd.f32 %v1190_v17, %v848_v60 }
 0x1a3   : > { %v851_v18 = vpop.f32.mrb[7].mxu1  ;;  %v1664_v22 = vadd.f32 %v1250_v0, %v1190_v17 }
 0x1a4   : > { %v1658_v21 = vadd.f32 %v1190_v17, %v851_v18 }
 0x1a5   : > { %865 = vmax.xlane.f32.xlu0 %v804_v19 }
 0x1a6   : > { %881 = vmax.xlane.f32.xlu1 %v836_v20 }
 0x1a9   : > { %875 = vmax.xlane.f32.xlu0 %v825_v24 }
 0x1aa   : > { %877 = vmax.xlane.f32.xlu1 %v828_v5 }
 0x1ad   : > { %871 = vmax.xlane.f32.xlu0 %v817_v7 }
 0x1ae   : > { %873 = vmax.xlane.f32.xlu1 %v820_v8 }
 0x1b1   : > { %887 = vmax.xlane.f32.xlu0 %v1656_v9 }
 0x1b2   : > { %889 = vmax.xlane.f32.xlu1 %v1658_v21 }
 0x1b5   : > { %891 = vmax.xlane.f32.xlu0 %v1662_v25 }
 0x1b6   : > { %893 = vmax.xlane.f32.xlu1 %v1664_v22 }
 0x226   : > { %v868_v26 = vpop.xlane.xlu0 %867 }
 0x227   : > { %v1668_v23 = vsub.f32 %v809_v34, %v868_v26  ;;  %v864_v27 = vpop.xlane.xlu1 %863 }
 0x228   : > { %v1671_v29 = vsub.f32 %v801_v37, %v864_v27 }
 0x229   : > { %v915_v28 = vmul.f32 1.442695, %v1668_v23 }
 0x22a   : > { %v884_v45 = vpop.xlane.xlu0 %883  ;;  %v911_v52 = vmul.f32 1.442695, %v1671_v29 }
 0x22b   : > { %1328 = vpow2.f32 %v915_v28  ;;  %v1673_v46 = vsub.f32 %v841_v43, %v884_v45  ;;  %v870_v47 = vpop.xlane.xlu1 %869 }
 0x22c   : > { %v1675_v48 = vsub.f32 %v812_v44, %v870_v47 }
 0x22d   : > { %v931_v49 = vmul.f32 1.442695, %v1673_v46 }
 0x22e   : > { %v917_v50 = vmul.f32 1.442695, %v1675_v48  ;;  %v880_v51 = vpop.xlane.xlu0 %879 }
 0x22f   : > { %1330 = vpow2.f32 %v931_v49  ;;  %v1680_v30 = vsub.f32 %v833_v54, %v880_v51  ;;  %v886_v31 = vpop.xlane.xlu1 %885 }
 0x230   : > { %1332 = vpow2.f32 %v917_v50  ;;  %v1682_v58 = vsub.f32 %v844_v57, %v886_v31 }
 0x231   : > { %v927_v62 = vmul.f32 1.442695, %v1680_v30  ;;  %1334 = vpow2.f32 %v911_v52 }
 0x232   : > { %v933_v63 = vmul.f32 1.442695, %v1682_v58  ;;  %v866_v2 = vpop.xlane.xlu0 %865 }
 0x233   : > { %v1686_v32 = vsub.f32 %v804_v19, %v866_v2  ;;  %v882_v59 = vpop.xlane.xlu1 %881 }
 0x234   : > { %1336 = vpow2.f32 %v933_v63  ;;  %v1688_v3 = vsub.f32 %v836_v20, %v882_v59 }
 0x235   : > { %v1329_v4 = vpop.eup %1328  ;;  %v913_v6 = vmul.f32 1.442695, %v1686_v32  ;;  %1338 = vpow2.f32 %v927_v62 }
 0x236   : > { %v876_v10 = vpop.xlane.xlu0 %875  ;;  %947 = vadd.xlane.f32.xlu0 %v1329_v4  ;;  %v929_v13 = vmul.f32 1.442695, %v1688_v3 }
 0x237   : > { %1340 = vpow2.f32 %v913_v6  ;;  %v1691_v11 = vsub.f32 %v825_v24, %v876_v10  ;;  %v878_v12 = vpop.xlane.xlu1 %877 }
 0x238   : > { %v1694_v14 = vsub.f32 %v828_v5, %v878_v12 }
 0x239   : > { %v1331_v15 = vpop.eup %1330  ;;  %v923_v16 = vmul.f32 1.442695, %v1691_v11 }
 0x23a   : > { %v1333_v17 = vpop.eup %1332  ;;  %v872_v33 = vpop.xlane.xlu0 %871  ;;  %963 = vadd.xlane.f32.xlu0 %v1331_v15  ;;  %v925_v36 = vmul.f32 1.442695, %v1694_v14 }
 0x23b   : > { %1342 = vpow2.f32 %v923_v16  ;;  %v1697_v34 = vsub.f32 %v817_v7, %v872_v33  ;;  %v874_v35 = vpop.xlane.xlu1 %873  ;;  %949 = vadd.xlane.f32.xlu1 %v1333_v17  ;;  %v1335_v38 = vpop.eup %1334 }
 0x23c   : > { %1344 = vpow2.f32 %v929_v13  ;;  %v1700_v37 = vsub.f32 %v820_v8, %v874_v35 }
 0x23d   : > { %v919_v39 = vmul.f32 1.442695, %v1697_v34 }
 0x23e   : > { %v1337_v40 = vpop.eup %1336  ;;  %943 = vadd.xlane.f32.xlu0 %v1335_v38  ;;  %v888_v41 = vpop.xlane.xlu0 %887  ;;  %v921_v53 = vmul.f32 1.442695, %v1700_v37 }
 0x23f   : > { %1346 = vpow2.f32 %v919_v39  ;;  %v1704_v42 = vsub.f32 %v1656_v9, %v888_v41  ;;  %965 = vadd.xlane.f32.xlu1 %v1337_v40  ;;  %v890_v43 = vpop.xlane.xlu1 %889  ;;  %v1339_v44 = vpop.eup %1338 }
 0x240   : > { %1348 = vpow2.f32 %v925_v36  ;;  %v1708_v54 = vsub.f32 %v1658_v21, %v890_v43 }
 0x241   : > { %v1341_v55 = vpop.eup %1340  ;;  %v935_v56 = vmul.f32 1.442695, %v1704_v42 }
 0x242   : > { %959 = vadd.xlane.f32.xlu0 %v1339_v44  ;;  %v892_v57 = vpop.xlane.xlu0 %891  ;;  %v937_v0 = vmul.f32 1.442695, %v1708_v54 }
 0x243   : > { %1350 = vpow2.f32 %v935_v56  ;;  %v1712_v60 = vsub.f32 %v1662_v25, %v892_v57  ;;  %945 = vadd.xlane.f32.xlu1 %v1341_v55  ;;  %v894_v61 = vpop.xlane.xlu1 %893 }
 0x244   : > { %1352 = vpow2.f32 %v921_v53  ;;  %v1716_v1 = vsub.f32 %v1664_v22, %v894_v61 }
 0x245   : > { %v1343_v18 = vpop.eup %1342  ;;  %v939_v19 = vmul.f32 1.442695, %v1712_v60 }
 0x246   : > { %v1345_v20 = vpop.eup %1344  ;;  %955 = vadd.xlane.f32.xlu0 %v1343_v18  ;;  %v941_v24 = vmul.f32 1.442695, %v1716_v1 }
 0x247   : > { %1354 = vpow2.f32 %v939_v19  ;;  %961 = vadd.xlane.f32.xlu1 %v1345_v20 }
 0x248   : > { %1356 = vpow2.f32 %v937_v0 }
 0x249   : > { %v1347_v5 = vpop.eup %1346  ;;  %1358 = vpow2.f32 %v941_v24 }
 0x24a   : > { %v1349_v7 = vpop.eup %1348  ;;  %951 = vadd.xlane.f32.xlu0 %v1347_v5 }
 0x24b   : > { %957 = vadd.xlane.f32.xlu1 %v1349_v7 }
 0x24d   : > { %v1351_v8 = vpop.eup %1350 }
 0x24e   : > { %v1353_v9 = vpop.eup %1352  ;;  %967 = vadd.xlane.f32.xlu0 %v1351_v8 }
 0x24f   : > { %953 = vadd.xlane.f32.xlu1 %v1353_v9 }
 0x251   : > { %v1355_v21 = vpop.eup %1354 }
 0x252   : > { %v1357_v25 = vpop.eup %1356  ;;  %971 = vadd.xlane.f32.xlu0 %v1355_v21 }
 0x253   : > { %969 = vadd.xlane.f32.xlu1 %v1357_v25  ;;  %v1359_v22 = vpop.eup %1358 }
 0x257   : > { %973 = vadd.xlane.f32.xlu1 %v1359_v22 }
 0x2c3   : > { %v948_v26 = vpop.xlane.xlu0 %947 }
 0x2c7   : > { %v964_v27 = vpop.xlane.xlu0 %963 }
 0x2c8   : > { %v950_v28 = vpop.xlane.xlu1 %949 }
 0x2c9   : > { %1360 = vlog2.f32 %v950_v28 }
 0x2ca   : > { %1362 = vlog2.f32 %v948_v26 }
 0x2cb   : > { %v944_v45 = vpop.xlane.xlu0 %943 }
 0x2cc   : > { %v966_v47 = vpop.xlane.xlu1 %965  ;;  %1364 = vlog2.f32 %v944_v45 }
 0x2cd   : > { %1366 = vlog2.f32 %v964_v27 }
 0x2ce   : > { %1368 = vlog2.f32 %v966_v47 }
 0x2cf   : > { %v960_v49 = vpop.xlane.xlu0 %959 }
 0x2d0   : > { %1370 = vlog2.f32 %v960_v49  ;;  %v946_v50 = vpop.xlane.xlu1 %945 }
 0x2d1   : > { %1372 = vlog2.f32 %v946_v50 }
 0x2d3   : > { %v956_v51 = vpop.xlane.xlu0 %955  ;;  %v1361_v52 = vpop.eup %1360 }
 0x2d4   : > { %v962_v31 = vpop.xlane.xlu1 %961  ;;  %v1363_v62 = vpop.eup %1362  ;;  %v982_v2 = vmul.f32 0.6931472, %v1361_v52 }
 0x2d5   : > { %1374 = vlog2.f32 %v962_v31  ;;  %v980_v12 = vmul.f32 0.6931472, %v1363_v62 }
 0x2d6   : > { %1376 = vlog2.f32 %v956_v51  ;;  %v1365_v63 = vpop.eup %1364  ;;  %v1010_v17 = vsub.f32 %v1675_v48, %v982_v2 }
 0x2d7   : > { %v952_v59 = vpop.xlane.xlu0 %951  ;;  %v1367_v4 = vpop.eup %1366  ;;  %v976_v15 = vmul.f32 0.6931472, %v1365_v63  ;;  %v1009_v39 = vsub.f32 %v1668_v23, %v980_v12 }
 0x2d8   : > { %1378 = vlog2.f32 %v952_v59  ;;  %v958_v6 = vpop.xlane.xlu1 %957  ;;  %v1369_v10 = vpop.eup %1368  ;;  %v996_v40 = vmul.f32 0.6931472, %v1367_v4 }
 0x2d9   : > { %1380 = vlog2.f32 %v958_v6  ;;  %v998_v35 = vmul.f32 0.6931472, %v1369_v10  ;;  %v1007_v41 = vsub.f32 %v1671_v29, %v976_v15  ;;  %v1030_v55 = vmax.f32 %v1009_v39, %v1010_v17 }
 0x2da   : > { %v1371_v13 = vpop.eup %1370  ;;  %v1017_v23 = vsub.f32 %v1673_v46, %v996_v40 }
 0x2db   : > { %v1373_v16 = vpop.eup %1372  ;;  %v968_v33 = vpop.xlane.xlu0 %967  ;;  %v992_v43 = vmul.f32 0.6931472, %v1371_v13  ;;  %v1018_v61 = vsub.f32 %v1682_v58, %v998_v35  ;;  %v1031_v5 = vrot.slane %v1030_v55, 4 }
 0x2dc   : > { %v978_v36 = vmul.f32 0.6931472, %v1373_v16  ;;  %v954_v38 = vpop.xlane.xlu1 %953 }
 0x2dd   : > { %1382 = vlog2.f32 %v954_v38  ;;  %v1015_v20 = vsub.f32 %v1680_v30, %v992_v43  ;;  %v1058_v8 = vmax.f32 %v1017_v23, %v1018_v61  ;;  %v1032_v28 = vmax.f32 %v1030_v55, %v1031_v5 }
 0x2de   : > { %v1008_v44 = vsub.f32 %v1686_v32, %v978_v36  ;;  %1384 = vlog2.f32 %v968_v33 }
 0x2df   : > { %v1375_v53 = vpop.eup %1374  ;;  %v972_v56 = vpop.xlane.xlu0 %971  ;;  %v1059_v45 = vrot.slane %v1058_v8, 4  ;;  %v1033_v63 = vrot.slane %v1032_v28, 2 }
 0x2e0   : > { %v1377_v57 = vpop.eup %1376  ;;  %v1023_v48 = vmax.f32 %v1007_v41, %v1008_v44  ;;  %v994_v0 = vmul.f32 0.6931472, %v1375_v53  ;;  %v970_v18 = vpop.xlane.xlu1 %969  ;;  %1386 = vlog2.f32 %v972_v56 }
 0x2e1   : > { %v988_v7 = vmul.f32 0.6931472, %v1377_v57  ;;  %1388 = vlog2.f32 %v970_v18  ;;  %v1060_v59 = vmax.f32 %v1058_v8, %v1059_v45  ;;  %v1034_v17 = vmax.f32 %v1032_v28, %v1033_v63 }
 0x2e2   : > { %v1379_v19 = vpop.eup %1378  ;;  %v1024_v29 = vrot.slane %v1023_v48, 4  ;;  %v1016_v24 = vsub.f32 %v1688_v3, %v994_v0 }
 0x2e3   : > { %v1381_v32 = vpop.eup %1380  ;;  %v984_v26 = vmul.f32 0.6931472, %v1379_v19  ;;  %v1013_v46 = vsub.f32 %v1691_v11, %v988_v7  ;;  %v1061_v36 = vrot.slane %v1060_v59, 2  ;;  %v1035_v56 = vrot.slane %v1034_v17, 1 }
 0x2e4   : > { %v1051_v9 = vmax.f32 %v1015_v20, %v1016_v24  ;;  %v974_v58 = vpop.xlane.xlu1 %973  ;;  %v1025_v21 = vmax.f32 %v1023_v48, %v1024_v29  ;;  %v990_v25 = vmul.f32 0.6931472, %v1381_v32 }
 0x2e5   : > { %1390 = vlog2.f32 %v974_v58  ;;  %v1011_v52 = vsub.f32 %v1697_v34, %v984_v26  ;;  %v1062_v61 = vmax.f32 %v1060_v59, %v1061_v36 }
 0x2e6   : > { %v1052_v22 = vrot.slane %v1051_v9, 4  ;;  %v1014_v30 = vsub.f32 %v1694_v14, %v990_v25  ;;  %v1026_v47 = vrot.slane %v1025_v21, 2 }
 0x2e7   : > { %v1383_v27 = vpop.eup %1382  ;;  %v1063_v32 = vrot.slane %v1062_v61, 1 }
 0x2e8   : > { %v986_v3 = vmul.f32 0.6931472, %v1383_v27  ;;  %v1044_v49 = vmax.f32 %v1013_v46, %v1014_v30  ;;  %v1385_v50 = vpop.eup %1384  ;;  %v1053_v51 = vmax.f32 %v1051_v9, %v1052_v22  ;;  %v1027_v10 = vmax.f32 %v1025_v21, %v1026_v47 }
 0x2e9   : > { %v1000_v12 = vmul.f32 0.6931472, %v1385_v50  ;;  %v1064_v26 = vmax.f32 %v1062_v61, %v1063_v32 }
 0x2ea   : > { %v1012_v31 = vsub.f32 %v1700_v37, %v986_v3  ;;  %v1387_v62 = vpop.eup %1386  ;;  %v1045_v2 = vrot.slane %v1044_v49, 4  ;;  %v1054_v14 = vrot.slane %v1053_v51, 2  ;;  %v1028_v37 = vrot.slane %v1027_v10, 1 }
 0x2eb   : > { %v1389_v6 = vpop.eup %1388  ;;  %v1004_v15 = vmul.f32 0.6931472, %v1387_v62  ;;  %v1019_v40 = vsub.f32 %v1704_v42, %v1000_v12 }
 0x2ec   : > { %v1037_v4 = vmax.f32 %v1011_v52, %v1012_v31  ;;  %v1046_v11 = vmax.f32 %v1044_v49, %v1045_v2  ;;  %v1002_v35 = vmul.f32 0.6931472, %v1389_v6  ;;  %v1055_v43 = vmax.f32 %v1053_v51, %v1054_v14 }
 0x2ed   : > { %v1021_v53 = vsub.f32 %v1712_v60, %v1004_v15  ;;  %v1029_v18 = vmax.f32 %v1027_v10, %v1028_v37 }
 0x2ee   : > { %v1038_v13 = vrot.slane %v1037_v4, 4  ;;  %v1047_v33 = vrot.slane %v1046_v11, 2  ;;  %v1020_v41 = vsub.f32 %v1708_v54, %v1002_v35  ;;  %v1056_v20 = vrot.slane %v1055_v43, 1 }
 0x2ef   : > { %v1391_v16 = vpop.eup %1390  ;;  %v1036_v54 = vmax.f32 %v1034_v17, %v1035_v56 }
 0x2f0   : > { %v1039_v34 = vmax.f32 %v1037_v4, %v1038_v13  ;;  %v1006_v38 = vmul.f32 0.6931472, %v1391_v16  ;;  %v1048_v39 = vmax.f32 %v1046_v11, %v1047_v33  ;;  %v1065_v57 = vmax.f32 %v1019_v40, %v1020_v41 }
 0x2f1   : > { %v1057_v9 = vmax.f32 %v1055_v43, %v1056_v20 }
 0x2f2   : > { %v1040_v44 = vrot.slane %v1039_v34, 2  ;;  %v1022_v55 = vsub.f32 %v1716_v1, %v1006_v38  ;;  %v1049_v19 = vrot.slane %v1048_v39, 1  ;;  %v1066_v23 = vrot.slane %v1065_v57, 4 }
 0x2f3   : > { %v1088_v1 = vsel %vm1087_vm1, %v1036_v54, %v1029_v18 }
 0x2f4   : > { %v1041_v48 = vmax.f32 %v1039_v34, %v1040_v44  ;;  %v1072_v0 = vmax.f32 %v1021_v53, %v1022_v55  ;;  %v1067_v24 = vmax.f32 %v1065_v57, %v1066_v23  ;;  %v1050_v7 = vmax.f32 %v1048_v39, %v1049_v19 }
 0x2f6   : > { %v1042_v42 = vrot.slane %v1041_v48, 1  ;;  %v1073_v29 = vrot.slane %v1072_v0, 4  ;;  %v1068_v8 = vrot.slane %v1067_v24, 2 }
 0x2f8   : > { %v1043_v60 = vmax.f32 %v1041_v48, %v1042_v42  ;;  %v1074_v5 = vmax.f32 %v1072_v0, %v1073_v29  ;;  %v1069_v25 = vmax.f32 %v1067_v24, %v1068_v8 }
 0x2fa   : > { %v1075_v58 = vrot.slane %v1074_v5, 2  ;;  %v1090_v21 = vsel %vm1089_vm2, %v1043_v60, %v1088_v1  ;;  %v1070_v46 = vrot.slane %v1069_v25, 1 }
 0x2fb   : > { %v1092_v22 = vsel %vm1091_vm3, %v1050_v7, %v1090_v21 }
 0x2fc   : > { %v1076_v27 = vmax.f32 %v1074_v5, %v1075_v58  ;;  %v1094_v28 = vsel %vm1093_vm4, %v1057_v9, %v1092_v22  ;;  %v1071_v3 = vmax.f32 %v1069_v25, %v1070_v46 }
 0x2fd   : > { %v1096_v45 = vsel %vm1095_vm5, %v1064_v26, %v1094_v28 }
 0x2fe   : > { %v1077_v30 = vrot.slane %v1076_v27, 1  ;;  %v1098_v49 = vsel %vm1097_vm6, %v1071_v3, %v1096_v45 }
 0x300   : > { %v1078_v47 = vmax.f32 %v1076_v27, %v1077_v30 }
 0x302   : > { %v1100_v50 = vsel %vm1099_vm7, %v1078_v47, %v1098_v49 }
 0x303   : > { %1102 = vst [vmem:[%s237_s27] sm:$0xff] %v1100_v50 }
 0x304   : > { %1405 = shalt.err (!%p1402_p5)
}
 0x305   : > { %s1406_s10 = scalar_lea.hbm %s1742_s5, 128  ;;  %s1410_s13 = scalar_lea.hbm %s1790_s4, 256 }
 0x306   : > { %p1407_p7 = scmp.ne.s32.totalorder %s1742_s5, %s1406_s10  ;;  %p1411_p12 = scmp.lt.u32.totalorder %s1742_s5, %s1790_s4 }
 0x307   : > { %p1412_p13 = scmp.lt.u32.totalorder %s1410_s13, %s1406_s10  ;;  %p1414_p1 = scmp.lt.u32.totalorder %s1406_s10, %s1742_s5 }
 0x308   : > { %p1408_p10 = pnand %p1407_p7, %p1525_p6 }
 0x309   : > { %p1413_p0 = por %p1412_p13, %p1411_p12 }
 0x30a   : > { %p1409_p11 = pneg %p1408_p10 }
 0x30b   : > { %p1415_p2 = por %p1414_p1, %p1413_p0 }
 0x30d   : > { %p1416_p3 = pnand %p1415_p2, %p1409_p11 }
 0x30f   : > { %1419 = shalt.err (!%p1416_p3)
}
 0x310   : > { %1269 = dma.vmem_to_hbm [thread:$0]  (%p1525_p6), %s1744_s28, 128, %s1742_s5, %s1104_s6  }
 0x311 PF: > { %s1129_s22 = sand.u32 1, %s1442_s15   ;;  %p1272_p4 = pnand %p1184_p9, %p1529_p8 }
 0x312   : > { %s1130_s23 = scalar_lea.sflag [#allocation5], %s1129_s22 }
 0x313   : > { %1437 = dma.done.wait (!%p1272_p4), %s1130_s23, 128  }
 0x314   : > { %1439 = vsyncadd (!%p1272_p4), %s1130_s23, 4294967168  ;;  %p14_p5 = scmp.ge.s32.totalorder %s1510_s21, 4   ;;  %s1793_s15 = smov %s1446_s16 }
 0x315   : > { %s1794_s16 = smov %s1450_s17  ;;  %s1795_s17 = smov %s1523_s24 }
 0x316   : > { %s1796_s18 = smov %s1510_s21  ;;  %16 = sbr.rel (!%p14_p5) target bundleno = 3 (0x3), region = 116 }
 0x31d   :  { %1135 = vsyncpa [#allocation5], 1 }
 0x31e   :  { %1137 = vsyncpa [#allocation5 + $0x1], 1 }

</bundles_post_ra>
